<compile_context>
chip_gen: v7x
topology: tpu7x:2x2x1
jax: 0.10.0
libtpu: 0.0.40
codegen_flags: <defaults>
</compile_context>

<pallas_src>
import jax
import jax.numpy as jnp
from jax.experimental import pallas as pl
from jax.experimental.pallas import tpu as pltpu


def patch_embed_kernel(p_ref, w_ref, add_ref, out_ref):
    # p_ref   : (TN, CPP)  row-tile of flattened patches
    # w_ref   : (CPP, E)   conv weight as matmul weight (resident)
    # add_ref : (TN, E)    pos_emb[patch rows] + conv bias (batch-independent)
    # out_ref : (TN, E)    patch-token embeddings
    emb = jnp.dot(p_ref[...], w_ref[...],
                  preferred_element_type=jnp.float32)       # MXU
    out_ref[...] = (emb + add_ref[...]).astype(out_ref.dtype)


def _pick_row_tile(N, CPP, E, in_itemsize, out_itemsize,
                   vmem_budget=24 * 1024 * 1024, target=512):
    """Largest multiple-of-8 divisor of N that fits a conservative VMEM budget.

    Budget model (double-buffered streaming tiles + weight, counted 2x for
    safety): 2*(TN*CPP*in + TN*E*4 + TN*E*out) + 2*CPP*E*in <= vmem_budget.
    24 MiB leaves headroom under the 32 MiB scoped default (and v7x's 64 MiB
    physical VMEM).
    """
    resident = 2 * CPP * E * in_itemsize
    per_row = CPP * in_itemsize + E * 4 + E * out_itemsize
    avail = max(vmem_budget - resident, 2 * 8 * per_row)
    max_rows = max(8, avail // (2 * per_row))
    cap = int(min(N, max_rows, target))
    tn = None
    t = 8
    while t <= cap:
        if N % t == 0:
            tn = t
        t += 8
    if tn is None:
        # No multiple-of-8 divisor fits: fall back to the full dim (allowed by
        # the (8,128) rule) — fine for moderate N such as ViT's 196.
        tn = N
    return tn


def patch_embedding_forward(x, conv_w, conv_b, class_token, pos_emb,
                            patch_size, *, input_dtype=None):
    """x: [B, C, H, W] (NCHW). Returns [B, N+1, E] matching the PyTorch module."""
    B, C, H, W = x.shape
    p = patch_size
    E = conv_w.shape[0]
    nH, nW = H // p, W // p
    N = nH * nW
    CPP = C * p * p

    # --- glue: extract non-overlapping patches, flattened in (c, ph, pw) order ---
    # TODO(synk): fuse this extraction into the kernel (see header note).
    patches = x.reshape(B, C, nH, p, nW, p)
    patches = patches.transpose(0, 2, 4, 1, 3, 5)           # [B, nH, nW, C, p, p]
    patches = patches.reshape(B * N, CPP)                   # [B*N, CPP]

    # conv weight [E, C, p, p] -> matmul weight [CPP, E]
    w2d = conv_w.reshape(E, CPP).T

    # Fold conv bias into the patch-row position embeddings.  Kept as [N, E]
    # (batch-independent); the BlockSpec below reuses it across the batch axis
    # instead of materializing a [B*N, E] broadcast in HBM.
    add = (pos_emb[0, 1:, :] + conv_b[None, :]).astype(jnp.float32)   # [N, E]

    # Optional bf16 streaming (v5e/v6e/v7x): halves patch-stream DMA bytes;
    # accumulation stays f32 inside the kernel.
    if input_dtype is not None:
        patches = patches.astype(input_dtype)
        w2d = w2d.astype(input_dtype)

    in_itemsize = jnp.dtype(patches.dtype).itemsize
    out_itemsize = jnp.dtype(x.dtype).itemsize

    TN = _pick_row_tile(N, CPP, E, in_itemsize, out_itemsize)
    nt = N // TN if N % TN == 0 else 1
    if nt * TN != N:            # full-dim fallback
        TN, nt = N, 1
    grid = (B, nt)

    flops = 2 * B * N * CPP * E
    bytes_accessed = (patches.size * in_itemsize
                      + w2d.size * in_itemsize
                      + add.size * 4
                      + B * N * E * out_itemsize)
    cost = pl.CostEstimate(flops=flops, transcendentals=0,
                           bytes_accessed=bytes_accessed)

    out = pl.pallas_call(
        patch_embed_kernel,
        out_shape=jax.ShapeDtypeStruct((B * N, E), x.dtype),
        grid_spec=pltpu.PrefetchScalarGridSpec(
            num_scalar_prefetch=0,
            grid=grid,
            in_specs=[
                # Patch rows of flattened [B*N, CPP]; block row = b*nt + n.
                pl.BlockSpec((TN, CPP), lambda b, n: (b * nt + n, 0)),
                # Weight: constant block index -> stays resident in VMEM.
                pl.BlockSpec((CPP, E), lambda b, n: (0, 0)),
                # Additive: indexed by patch-row tile only (batch-independent).
                pl.BlockSpec((TN, E), lambda b, n: (n, 0)),
            ],
            out_specs=pl.BlockSpec((TN, E), lambda b, n: (b * nt + n, 0)),
        ),
        compiler_params=pltpu.CompilerParams(
            dimension_semantics=("parallel", "parallel")),
        cost_estimate=cost,
    )(patches, w2d, add)

    # Restore [B, N, E] and prepend the class-token row (computed outside the
    # kernel so every kernel store stays a plain dense tile write).
    tokens = out.reshape(B, N, E)
    cls_row = class_token + pos_emb[:, 0:1, :]               # [B, 1, E]
    return jnp.concatenate([cls_row, tokens], axis=1)


def reference_forward(x, conv_w, conv_b, class_token, pos_emb, patch_size):
    """Pure-JAX reference matching the PyTorch forward exactly."""
    conv_out = jax.lax.conv_general_dilated(
        x, conv_w,
        window_strides=(patch_size, patch_size),
        padding="VALID",
        dimension_numbers=("NCHW", "OIHW", "NCHW"),
    ) + conv_b.reshape(1, -1, 1, 1)
    B, E, nH, nW = conv_out.shape
    tokens = conv_out.transpose(0, 2, 3, 1).reshape(B, nH * nW, E)
    return jnp.concatenate([class_token, tokens], axis=1) + pos_emb


if __name__ == "__main__":
    # Module-level constants from the PyTorch file:
    #   channels = 1; patch_size = image_size // 8
    #   embedding_dims = channels * patch_size**2
    #   patches = (image_size // patch_size) ** 2
    batch_size = 2
    channels = 1
    image_size = 32
    patch_size = image_size // 8                      # 4
    embedding_dims = channels * patch_size ** 2       # 16
    patches = (image_size // patch_size) ** 2         # 64

    key = jax.random.PRNGKey(0)
    k_x, k_w, k_b, k_cls, k_pos = jax.random.split(key, 5)

    x = jax.random.normal(k_x, (batch_size, channels, image_size, image_size),
                          dtype=jnp.float32)
    # Conv2d(in_channels=channels, out_channels=embedding_dims,
    #        kernel_size=patch_size, stride=patch_size) parameters:
    conv_w = jax.random.normal(
        k_w, (embedding_dims, channels, patch_size, patch_size),
        dtype=jnp.float32) * 0.1
    conv_b = jax.random.normal(k_b, (embedding_dims,), dtype=jnp.float32) * 0.1
    # nn.Parameter(torch.rand(...)) -> uniform [0, 1)
    class_token = jax.random.uniform(
        k_cls, (batch_size, 1, embedding_dims), dtype=jnp.float32)
    pos_emb = jax.random.uniform(
        k_pos, (1, patches + 1, embedding_dims), dtype=jnp.float32)

    out = patch_embedding_forward(x, conv_w, conv_b, class_token, pos_emb,
                                  patch_size)
    out = jax.block_until_ready(out)

    ref = reference_forward(x, conv_w, conv_b, class_token, pos_emb, patch_size)
    assert out.shape == (batch_size, patches + 1, embedding_dims), out.shape
    assert jnp.allclose(out, ref, atol=1e-5, rtol=1e-5), \
        float(jnp.max(jnp.abs(out - ref)))

    print("KERNEL_OK")
</pallas_src>

<mosaic_0001>
module attributes {stable_mosaic.version = 11 : i64} {
  func.func @patch_embed_kernel(%arg0: i32, %arg1: i32, %arg2: memref<64x16xf32, #tpu.memory_space<vmem>>, %arg3: memref<16x16xf32, #tpu.memory_space<vmem>>, %arg4: memref<64x16xf32, #tpu.memory_space<vmem>>, %arg5: memref<64x16xf32, #tpu.memory_space<vmem>>) attributes {dimension_semantics = [#tpu.dimension_semantics<parallel>, #tpu.dimension_semantics<parallel>], iteration_bounds = array<i64: 2, 1>, scalar_prefetch = 0 : i64, scratch_operands = 0 : i64, tpu.core_type = #tpu.core_type<tc>, window_params = [{transform_indices = @transform_0, window_bounds = array<i64: 64, 16>}, {pipeline_mode = #tpu.pipeline_mode<synchronous>, transform_indices = @transform_1, window_bounds = array<i64: 16, 16>}, {transform_indices = @transform_2, window_bounds = array<i64: 64, 16>}, {transform_indices = @transform_3, window_bounds = array<i64: 64, 16>}]} {
    %c0 = arith.constant 0 : index
    %c0_0 = arith.constant 0 : index
    %0 = vector.load %arg2[%c0, %c0_0] : memref<64x16xf32, #tpu.memory_space<vmem>>, vector<64x16xf32>
    %c0_1 = arith.constant 0 : index
    %c0_2 = arith.constant 0 : index
    %1 = vector.load %arg3[%c0_1, %c0_2] : memref<16x16xf32, #tpu.memory_space<vmem>>, vector<16x16xf32>
    %cst = arith.constant dense<0.000000e+00> : vector<64x16xf32>
    %2 = tpu.matmul %0, %1, %cst {dimension_numbers = #tpu.dot_dimension_numbers<[1], [0], [0], [1], [0, 0, 1, 1], [], []>} : vector<64x16xf32>, vector<16x16xf32>, vector<64x16xf32> -> vector<64x16xf32>
    %c0_3 = arith.constant 0 : index
    %c0_4 = arith.constant 0 : index
    %3 = vector.load %arg4[%c0_3, %c0_4] : memref<64x16xf32, #tpu.memory_space<vmem>>, vector<64x16xf32>
    %4 = arith.addf %2, %3 : vector<64x16xf32>
    %c0_5 = arith.constant 0 : index
    %c0_6 = arith.constant 0 : index
    %5 = vector.load %arg5[%c0_5, %c0_6] : memref<64x16xf32, #tpu.memory_space<vmem>>, vector<64x16xf32>
    tpu.vector_store %arg5[%c0_5, %c0_6], %4 {strides = array<i32>} : memref<64x16xf32, #tpu.memory_space<vmem>>, vector<64x16xf32>,
    return
  }
  func.func @transform_0(%arg0: i32, %arg1: i32) -> (i32, i32) {
    %c1_i32 = arith.constant 1 : i32
    %0 = arith.muli %arg0, %c1_i32 : i32
    %1 = arith.addi %0, %arg1 : i32
    %c0_i32 = arith.constant 0 : i32
    %c0_i32_0 = arith.constant 0 : i32
    return %1, %c0_i32 : i32, i32
  }
  func.func @transform_1(%arg0: i32, %arg1: i32) -> (i32, i32) {
    %c0_i32 = arith.constant 0 : i32
    %c0_i32_0 = arith.constant 0 : i32
    %c0_i32_1 = arith.constant 0 : i32
    return %c0_i32, %c0_i32_0 : i32, i32
  }
  func.func @transform_2(%arg0: i32, %arg1: i32) -> (i32, i32) {
    %c0_i32 = arith.constant 0 : i32
    %c0_i32_0 = arith.constant 0 : i32
    return %arg1, %c0_i32 : i32, i32
  }
  func.func @transform_3(%arg0: i32, %arg1: i32) -> (i32, i32) {
    %c1_i32 = arith.constant 1 : i32
    %0 = arith.muli %arg0, %c1_i32 : i32
    %1 = arith.addi %0, %arg1 : i32
    %c0_i32 = arith.constant 0 : i32
    %c0_i32_0 = arith.constant 0 : i32
    return %1, %c0_i32 : i32, i32
  }
}

</mosaic_0001>

<bundles_post_ra>
// kernel: tpu_custom_call.1
= control target key start
LH: loop header
LB: loop body
LE: loop exit
PB: predicated region body
PF: predicated region fallthrough
CT: control target
= control target key end

     0   :  { %s579_s12 = smov 0   ;;  %s581_s13 = smov 0   ;;  %s658_s0 = inlined_call_operand.vmem [shape: f32[128,16], index: 0, kind: input, shape index: {}]   ;;  %s659_s1 = inlined_call_operand.vmem [shape: f32[16,16], index: 1, kind: input, shape index: {}]   ;;  %s660_s2 = inlined_call_operand.vmem [shape: f32[64,16], index: 2, kind: input, shape index: {}]   ;;  %s661_s3 = inlined_call_operand.vmem [shape: f32[128,16], index: 3, kind: output, shape index: {}]  }
   0x1   :  { %s583_s14 = smov 0  }
   0x2 LB: > { %s25_s15 = sadd.s32 1, %s553_s13  ;;  %p464_p0 = scmp.ge.s32.totalorder %s557_s14, 1  ;;  %s557_s14 = sphi %s583_s14, %s13_s14   ;;  %s553_s13 = sphi %s581_s13, %s663_s13   ;;  %s549_s12 = sphi %s579_s12, %s662_s12  }
   0x3   : > { %p27_p1 = scmp.ge.s32.totalorder %s25_s15, 2  ;;  %p167_p2 = scmp.lt.s32.totalorder %s557_s14, 3 }
   0x5   : > { %s665_s15 = smov (%p27_p1, %s25_s15), 0  ;;  %p168_p3 = pnand %p464_p0, %p167_p2 }
   0x6   : > { %v228_v0 = vld [vmem:[%s659_s1] sm:$0xff] (!%p168_p3)  ;;  %v229_v1 = vld [vmem:[%s659_s1 + $0x8] sm:$0xff] (!%p168_p3)  ;;  %s465_s20 = sshll.u32 (!%p168_p3), %s549_s12, 3  ;;  %vm238_vm0 = vcmask (!%p168_p3), 130048   ;;  %v233_v23 = vld [vmem:[%s660_s2 + $0x18] sm:$0xff] (!%p168_p3) }
   0x7   : > { %171 = sbr.rel (%p168_p3) target bundleno = 240 (0xf0), region = 32  ;;  %v505_v2 = vpack.c.bf16 (!%p168_p3), %v229_v1, %v228_v0  ;;  %p200_p4 = scmp.lt.s32.totalorder (!%p168_p3), %s465_s20, 15  ;;  %v231_v11 = vld [vmem:[%s660_s2 + $0x8] sm:$0xff] (!%p168_p3)  ;;  %v230_v13 = vld [vmem:[%s660_s2] sm:$0xff] (!%p168_p3)  ;;  %v237_v24 = vld [vmem:[%s660_s2 + $0x38] sm:$0xff] (!%p168_p3) }
   0x8   : > { %v235_v12 = vld [vmem:[%s660_s2 + $0x28] sm:$0xff] (!%p168_p3)  ;;  %v234_v14 = vld [vmem:[%s660_s2 + $0x20] sm:$0xff] (!%p168_p3)  ;;  %v232_v25 = vld [vmem:[%s660_s2 + $0x10] sm:$0xff] (!%p168_p3) }
   0x9   : > { %506 = vmatprep.subr.bf16.mxu0 (!%p168_p3), %v505_v2  ;;  %509 = vmatprep.subr.bf16.mxu1 (!%p168_p3), %v505_v2  ;;  %v236_v26 = vld [vmem:[%s660_s2 + $0x30] sm:$0xff] (!%p168_p3) }
   0xa   : > { %508 = vmatpush3.bf16.msra.mxu0 (!%p168_p3), %v505_v2  ;;  %510 = vmatpush3.bf16.msra.mxu1 (!%p168_p3), %v505_v2 }
   0xe   : > { %s667_s20 = smov (!%p200_p4, %s465_s20), 15 }
   0xf   : > { %s466_s21 = sshll.u32 %s667_s20, 3 }
  0x10   : > { %s203_s24 = scalar_lea.vmem %s658_s0, %s466_s21  ;;  %s217_s8 = scalar_lea.vmem %s661_s3, %s466_s21 }
  0x11   : > { %v220_v3 = vld [vmem:[%s203_s24] sm:$0xff]  ;;  %v221_v5 = vld [vmem:[%s203_s24 + $0x8] sm:$0xff]  ;;  %v222_v7 = vld [vmem:[%s203_s24 + $0x10] sm:$0xff] }
  0x12   : > { %v224_v4 = vld [vmem:[%s203_s24 + $0x20] sm:$0xff]  ;;  %493 = vmatprep.mubr.msk.f32.mxu0 %vm238_vm0, %v220_v3  ;;  %v225_v6 = vld [vmem:[%s203_s24 + $0x28] sm:$0xff]  ;;  %v226_v8 = vld [vmem:[%s203_s24 + $0x30] sm:$0xff] }
  0x13   : > { %499 = vmatprep.mubr.msk.f32.mxu1 %vm238_vm0, %v224_v4  ;;  %494 = vmatmul.mubr.msk.f32.vlgmr.msra.gmra.mrb[0].mxu0 %vm238_vm0, %v221_v5  ;;  %v223_v9 = vld [vmem:[%s203_s24 + $0x18] sm:$0xff] }
  0x14   : > { %500 = vmatmul.mubr.msk.f32.vlgmr.msra.gmra.mrb[0].mxu1 %vm238_vm0, %v225_v6  ;;  %496 = vmatprep.mubr.msk.f32.mxu0 %vm238_vm0, %v222_v7  ;;  %v227_v10 = vld [vmem:[%s203_s24 + $0x38] sm:$0xff] }
  0x15   : > { %502 = vmatprep.mubr.msk.f32.mxu1 %vm238_vm0, %v226_v8 }
  0x17   : > { %497 = vmatmul.mubr.msk.f32.gmra.mrb[2].mxu0 %vm238_vm0, %v223_v9 }
  0x18   : > { %503 = vmatmul.mubr.msk.f32.gmra.mrb[2].mxu1 %vm238_vm0, %v227_v10 }
  0xe6   : > { %v495_v15 = vpop.f32.mrb[0].mxu0 }
  0xe7   : > { %v501_v16 = vpop.f32.mrb[0].mxu1  ;;  %v335_v17 = vadd.f32 %v495_v15, %v231_v11  ;;  %v329_v19 = vpop.f32.mrb[1].mxu0 }
  0xe8   : > { %v355_v18 = vadd.f32 %v501_v16, %v235_v12  ;;  %v349_v20 = vpop.f32.mrb[1].mxu1  ;;  %v330_v21 = vadd.f32 %v329_v19, %v230_v13 }
  0xe9   : > { %v350_v22 = vadd.f32 %v349_v20, %v234_v14  ;;  %369 = vst.msk [vmem:[%s217_s8 + $0x8] sm:$0xff] %vm238_vm0, %v335_v17 }
  0xea   : > { %373 = vst.msk [vmem:[%s217_s8 + $0x28] sm:$0xff] %vm238_vm0, %v355_v18  ;;  %368 = vst.msk [vmem:[%s217_s8] sm:$0xff] %vm238_vm0, %v330_v21  ;;  %v498_v27 = vpop.f32.mrb[2].mxu0 }
  0xeb   : > { %372 = vst.msk [vmem:[%s217_s8 + $0x20] sm:$0xff] %vm238_vm0, %v350_v22  ;;  %v504_v28 = vpop.f32.mrb[2].mxu1  ;;  %v345_v29 = vadd.f32 %v498_v27, %v233_v23  ;;  %v339_v31 = vpop.f32.mrb[3].mxu0 }
  0xec   : > { %v365_v30 = vadd.f32 %v504_v28, %v237_v24  ;;  %v359_v32 = vpop.f32.mrb[3].mxu1  ;;  %v340_v33 = vadd.f32 %v339_v31, %v232_v25 }
  0xed   : > { %v360_v34 = vadd.f32 %v359_v32, %v236_v26  ;;  %371 = vst.msk [vmem:[%s217_s8 + $0x18] sm:$0xff] %vm238_vm0, %v345_v29 }
  0xee   : > { %375 = vst.msk [vmem:[%s217_s8 + $0x38] sm:$0xff] %vm238_vm0, %v365_v30  ;;  %370 = vst.msk [vmem:[%s217_s8 + $0x10] sm:$0xff] %vm238_vm0, %v340_v33 }
  0xef   : > { %374 = vst.msk [vmem:[%s217_s8 + $0x30] sm:$0xff] %vm238_vm0, %v360_v34 }
  0xf0 PF: > { %s13_s14 = sadd.s32 1, %s557_s14   ;;  %s662_s12 = smov %s553_s13 }
  0xf1   : > { %p10_p5 = scmp.ge.s32.totalorder %s13_s14, 4   ;;  %s663_s13 = smov %s665_s15 }
  0xf3   :  { %12 = sbr.rel (!%p10_p5) target bundleno = 2 (0x2), region = 65 }

</bundles_post_ra>
